<compile_context>
chip_gen: v7x
topology: tpu7x:2x2x1
jax: 0.10.0
libtpu: 0.0.40
codegen_flags: <defaults>
</compile_context>

<pallas_src>
import functools

import jax
import jax.numpy as jnp
from jax.experimental import pallas as pl
from jax.experimental.pallas import tpu as pltpu

_SUBLANE = {4: 8, 2: 16, 1: 32}  # itemsize -> sublane packing (f32 / bf16 / int8)


def _round_up(x, m):
    return ((x + m - 1) // m) * m


def _divisor_candidates(total, multiple):
    """Divisors of `total` that are multiples of `multiple`, plus `total`, descending."""
    cands = {total}
    d = multiple
    while d < total:
        if total % d == 0:
            cands.add(d)
        d += multiple
    return sorted(cands, reverse=True)


def _batch_tile(n, sub, target=128):
    """Batch tile: multiple of the sublane count (or == N); grid[0] >= 2 when possible."""
    if n <= target:
        half = -(-n // 2)
        tn = _round_up(half, sub)
        return tn if tn < n else n      # split for v7x's 2 TCs when legal
    return _round_up(target, sub)


def _vmem_plan():
    """(vmem_limit_bytes, per-buffer x budget, per-buffer weight budget)."""
    try:
        cap = int(pltpu.get_tpu_info().vmem_capacity_bytes)
    except Exception:
        cap = 64 << 20                  # conservative (v7x physical per-TC)
    limit = max(32 << 20, min(cap - (16 << 20), 96 << 20))
    # 2 x-buffers + margin out of what's left after weight/acc/out residents.
    x_budget = max(4 << 20, min(16 << 20, (limit - (12 << 20)) // 3))
    w_budget = 4 << 20
    return limit, x_budget, w_budget


def _choose_tiles(n, c, hw, o, x_itemsize, w_itemsize, x_budget, w_budget):
    """Pick (tn, tc, ts) so the real (padded, double-buffered) VMEM use fits."""
    sub_x = _SUBLANE.get(x_itemsize, 8)
    sub_w = _SUBLANE.get(w_itemsize, 8)
    step = max(sub_x, sub_w)            # channel tile must satisfy both dtypes
    o_lanes = _round_up(o, 128)

    def w_tile_bytes(tc):
        return _round_up(tc, sub_w) * o_lanes * w_itemsize

    def x_tile_bytes(tn, tc, ts):
        return tn * _round_up(tc, sub_x) * _round_up(ts, 128) * x_itemsize

    # Channel tiles: exact divisors of C (reduction axis -> no OOB padding).
    tc_cands = _divisor_candidates(c, step)
    fitting = [t for t in tc_cands if w_tile_bytes(t) <= w_budget]
    tc_cands = fitting if fitting else [tc_cands[-1]]
    # Spatial tiles: exact divisors of HW that are lane-aligned, plus HW.
    ts_cands = _divisor_candidates(hw, 128)

    tn = _batch_tile(n, sub_x)
    while True:
        # Prefer full-HW contiguous slabs (best DMA bursts); shrink channels
        # first, spatial tile second, batch tile last.
        for ts in ts_cands:
            for tc in tc_cands:
                if x_tile_bytes(tn, tc, ts) <= x_budget:
                    return tn, tc, ts
        new_tn = max(sub_x, _round_up(tn // 2, sub_x))
        if new_tn >= tn:
            # Give up on the budget: smallest legal tiles; rely on the raised
            # vmem limit.
            return tn, tc_cands[-1], ts_cands[-1]
        tn = new_tn


def final_module_kernel(x_ref, w_ref, b_ref, o_ref, acc_pool_ref, acc_out_ref,
                        *, inv_hw):
    # x_ref: (tn, tc, ts), w_ref: (tc, O), b_ref: (1, O), o_ref: (tn, O)
    # acc_pool_ref: (tn, tc) f32   spatial-sum accumulator for this channel tile
    # acc_out_ref : (tn, O)  f32   output accumulator across channel tiles
    c = pl.program_id(1)
    s = pl.program_id(2)
    last_c = pl.num_programs(1) - 1
    last_s = pl.num_programs(2) - 1

    @pl.when(jnp.logical_and(c == 0, s == 0))
    def _():
        acc_out_ref[...] = jnp.zeros_like(acc_out_ref)

    @pl.when(s == 0)
    def _():
        acc_pool_ref[...] = jnp.zeros_like(acc_pool_ref)

    # Accumulate the spatial sum in f32 WITHOUT upcasting the big (tn,tc,ts) tile.
    acc_pool_ref[...] += jnp.sum(x_ref[...], axis=-1, dtype=jnp.float32)

    @pl.when(s == last_s)
    def _():
        # Global average pool (== F.avg_pool2d(x, x.size()[-2:])) for this
        # channel tile.  Dropout(0.5) is identity in eval mode.
        # TODO(synk): training-mode dropout (stochastic masking) not implemented.
        pooled = (acc_pool_ref[...] * inv_hw).astype(w_ref.dtype)
        # 1x1 conv on a 1x1 map == dense layer; weight stays in native dtype.
        acc_out_ref[...] += jnp.dot(pooled, w_ref[...],
                                    preferred_element_type=jnp.float32)

    @pl.when(jnp.logical_and(c == last_c, s == last_s))
    def _():
        y = acc_out_ref[...] + b_ref[...].astype(jnp.float32)
        o_ref[...] = y.astype(o_ref.dtype)


def final_module_forward(x_nchw, weight, bias):
    """x_nchw: (N, C, H, W); weight: (O, C, 1, 1); bias: (O,) -> (N, O, 1, 1)."""
    N, C, H, W = x_nchw.shape
    O = weight.shape[0]
    HW = H * W

    x_flat = x_nchw.reshape(N, C, HW)
    # Transpose once in the wrapper (outside the grid loop) -> (C, O).
    w2d = jnp.transpose(weight.reshape(O, C))
    b2d = bias.reshape(1, O)

    vmem_limit, x_budget, w_budget = _vmem_plan()
    tn, tc, ts = _choose_tiles(N, C, HW, O,
                               x_flat.dtype.itemsize, w2d.dtype.itemsize,
                               x_budget, w_budget)
    grid_n = pl.cdiv(N, tn)
    grid = (grid_n, C // tc, HW // ts)

    cost = pl.CostEstimate(
        flops=2 * N * C * O + N * C * HW,
        transcendentals=0,
        bytes_accessed=(x_flat.size * x_flat.dtype.itemsize
                        + grid_n * w2d.size * w2d.dtype.itemsize
                        + grid_n * b2d.size * b2d.dtype.itemsize
                        + N * O * x_flat.dtype.itemsize),
    )

    kernel = functools.partial(final_module_kernel, inv_hw=1.0 / HW)

    out = pl.pallas_call(
        kernel,
        out_shape=jax.ShapeDtypeStruct((N, O), x_nchw.dtype),
        grid_spec=pltpu.PrefetchScalarGridSpec(
            num_scalar_prefetch=0,
            grid=grid,
            in_specs=[
                pl.BlockSpec((tn, tc, ts), lambda n, c, s: (n, c, s)),
                pl.BlockSpec((tc, O), lambda n, c, s: (c, 0)),
                pl.BlockSpec((1, O), lambda n, c, s: (0, 0)),
            ],
            out_specs=pl.BlockSpec((tn, O), lambda n, c, s: (n, 0)),
            scratch_shapes=[
                pltpu.VMEM((tn, tc), jnp.float32),   # spatial-sum accumulator
                pltpu.VMEM((tn, O), jnp.float32),    # output accumulator
            ],
        ),
        compiler_params=pltpu.CompilerParams(
            dimension_semantics=("parallel", "arbitrary", "arbitrary"),
            vmem_limit_bytes=int(vmem_limit),
        ),
        cost_estimate=cost,
    )(x_flat, w2d, b2d)

    return out.reshape(N, O, 1, 1)


if __name__ == "__main__":
    key = jax.random.PRNGKey(0)
    kx, kw, kb = jax.random.split(key, 3)

    N, C_in, H, W = 2, 4, 16, 16
    C_out = 8

    x = jax.random.normal(kx, (N, C_in, H, W), dtype=jnp.float32)
    # Deterministic parameter init (mimics Conv2d 1x1 weight/bias shapes)
    weight = jax.random.normal(kw, (C_out, C_in, 1, 1), dtype=jnp.float32) * 0.1
    bias = jax.random.normal(kb, (C_out,), dtype=jnp.float32) * 0.1

    y = final_module_forward(x, weight, bias)
    jax.block_until_ready(y)

    # Cross-check against plain-JAX reference
    pooled_ref = jnp.mean(x, axis=(2, 3))                       # (N, C)
    y_ref = pooled_ref @ weight.reshape(C_out, C_in).T + bias   # (N, O)
    y_ref = y_ref.reshape(N, C_out, 1, 1)
    assert jnp.allclose(y, y_ref, atol=1e-5), "mismatch vs reference"

    print("KERNEL_OK")
</pallas_src>

<mosaic_0001>
module attributes {stable_mosaic.version = 11 : i64} {
  func.func @final_module_kernel(%arg0: i32, %arg1: i32, %arg2: i32, %arg3: memref<2x4x256xf32, #tpu.memory_space<vmem>>, %arg4: memref<4x8xf32, #tpu.memory_space<vmem>>, %arg5: memref<1x8xf32, #tpu.memory_space<vmem>>, %arg6: memref<2x8xf32, #tpu.memory_space<vmem>>, %arg7: memref<2x4xf32, #tpu.memory_space<vmem>>, %arg8: memref<2x8xf32, #tpu.memory_space<vmem>>) attributes {dimension_semantics = [#tpu.dimension_semantics<parallel>, #tpu.dimension_semantics<arbitrary>, #tpu.dimension_semantics<arbitrary>], iteration_bounds = array<i64: 1, 1, 1>, scalar_prefetch = 0 : i64, scratch_operands = 2 : i64, tpu.core_type = #tpu.core_type<tc>, window_params = [{transform_indices = @transform_0, window_bounds = array<i64: 2, 4, 256>}, {transform_indices = @transform_1, window_bounds = array<i64: 4, 8>}, {pipeline_mode = #tpu.pipeline_mode<synchronous>, transform_indices = @transform_2, window_bounds = array<i64: 1, 8>}, {transform_indices = @transform_3, window_bounds = array<i64: 2, 8>}]} {
    %c0_i32 = arith.constant 0 : i32
    %0 = arith.cmpi eq, %arg1, %c0_i32 : i32
    %c0_i32_0 = arith.constant 0 : i32
    %1 = arith.cmpi eq, %arg2, %c0_i32_0 : i32
    %2 = arith.andi %0, %1 : i1
    %3 = arith.extui %2 : i1 to i32
    %c0_i32_1 = arith.constant 0 : i32
    %4 = arith.cmpi ne, %3, %c0_i32_1 : i32
    scf.if %4 {
      %cst_15 = arith.constant 0.000000e+00 : f32
      %21 = vector.broadcast %cst_15 : f32 to vector<2x8xf32>
      %c0_16 = arith.constant 0 : index
      %c0_17 = arith.constant 0 : index
      %22 = vector.load %arg8[%c0_16, %c0_17] : memref<2x8xf32, #tpu.memory_space<vmem>>, vector<2x8xf32>
      tpu.vector_store %arg8[%c0_16, %c0_17], %21 {strides = array<i32>} : memref<2x8xf32, #tpu.memory_space<vmem>>, vector<2x8xf32>,
    } else {
    }
    %c0_i32_2 = arith.constant 0 : i32
    %5 = arith.cmpi eq, %arg2, %c0_i32_2 : i32
    %6 = arith.extui %5 : i1 to i32
    %c0_i32_3 = arith.constant 0 : i32
    %7 = arith.cmpi ne, %6, %c0_i32_3 : i32
    scf.if %7 {
      %cst_15 = arith.constant 0.000000e+00 : f32
      %21 = vector.broadcast %cst_15 : f32 to vector<2x4xf32>
      %c0_16 = arith.constant 0 : index
      %c0_17 = arith.constant 0 : index
      %22 = vector.load %arg7[%c0_16, %c0_17] : memref<2x4xf32, #tpu.memory_space<vmem>>, vector<2x4xf32>
      tpu.vector_store %arg7[%c0_16, %c0_17], %21 {strides = array<i32>} : memref<2x4xf32, #tpu.memory_space<vmem>>, vector<2x4xf32>,
    } else {
    }
    %c0 = arith.constant 0 : index
    %c0_4 = arith.constant 0 : index
    %8 = vector.load %arg7[%c0, %c0_4] : memref<2x4xf32, #tpu.memory_space<vmem>>, vector<2x4xf32>
    %c0_5 = arith.constant 0 : index
    %c0_6 = arith.constant 0 : index
    %c0_7 = arith.constant 0 : index
    %9 = vector.load %arg3[%c0_5, %c0_6, %c0_7] : memref<2x4x256xf32, #tpu.memory_space<vmem>>, vector<2x4x256xf32>
    %cst = arith.constant dense<0.000000e+00> : vector<2x4xf32>
    %10 = vector.multi_reduction <add>, %9, %cst [2] : vector<2x4x256xf32> to vector<2x4xf32>
    %11 = arith.addf %8, %10 : vector<2x4xf32>
    %c0_8 = arith.constant 0 : index
    %c0_9 = arith.constant 0 : index
    %12 = vector.load %arg7[%c0_8, %c0_9] : memref<2x4xf32, #tpu.memory_space<vmem>>, vector<2x4xf32>
    tpu.vector_store %arg7[%c0_8, %c0_9], %11 {strides = array<i32>} : memref<2x4xf32, #tpu.memory_space<vmem>>, vector<2x4xf32>,
    %c0_i32_10 = arith.constant 0 : i32
    %13 = arith.cmpi eq, %arg2, %c0_i32_10 : i32
    %14 = arith.extui %13 : i1 to i32
    %c0_i32_11 = arith.constant 0 : i32
    %15 = arith.cmpi ne, %14, %c0_i32_11 : i32
    scf.if %15 {
      %c0_15 = arith.constant 0 : index
      %c0_16 = arith.constant 0 : index
      %21 = vector.load %arg7[%c0_15, %c0_16] : memref<2x4xf32, #tpu.memory_space<vmem>>, vector<2x4xf32>
      %cst_17 = arith.constant 3.906250e-03 : f32
      %22 = vector.broadcast %cst_17 : f32 to vector<2x4xf32>
      %23 = arith.mulf %21, %22 : vector<2x4xf32>
      %c0_18 = arith.constant 0 : index
      %c0_19 = arith.constant 0 : index
      %24 = vector.load %arg8[%c0_18, %c0_19] : memref<2x8xf32, #tpu.memory_space<vmem>>, vector<2x8xf32>
      %c0_20 = arith.constant 0 : index
      %c0_21 = arith.constant 0 : index
      %25 = vector.load %arg4[%c0_20, %c0_21] : memref<4x8xf32, #tpu.memory_space<vmem>>, vector<4x8xf32>
      %cst_22 = arith.constant dense<0.000000e+00> : vector<2x8xf32>
      %26 = tpu.matmul %23, %25, %cst_22 {dimension_numbers = #tpu.dot_dimension_numbers<[1], [0], [0], [1], [0, 0, 1, 1], [], []>} : vector<2x4xf32>, vector<4x8xf32>, vector<2x8xf32> -> vector<2x8xf32>
      %27 = arith.addf %24, %26 : vector<2x8xf32>
      %c0_23 = arith.constant 0 : index
      %c0_24 = arith.constant 0 : index
      %28 = vector.load %arg8[%c0_23, %c0_24] : memref<2x8xf32, #tpu.memory_space<vmem>>, vector<2x8xf32>
      tpu.vector_store %arg8[%c0_23, %c0_24], %27 {strides = array<i32>} : memref<2x8xf32, #tpu.memory_space<vmem>>, vector<2x8xf32>,
    } else {
    }
    %c0_i32_12 = arith.constant 0 : i32
    %16 = arith.cmpi eq, %arg1, %c0_i32_12 : i32
    %c0_i32_13 = arith.constant 0 : i32
    %17 = arith.cmpi eq, %arg2, %c0_i32_13 : i32
    %18 = arith.andi %16, %17 : i1
    %19 = arith.extui %18 : i1 to i32
    %c0_i32_14 = arith.constant 0 : i32
    %20 = arith.cmpi ne, %19, %c0_i32_14 : i32
    scf.if %20 {
      %c0_15 = arith.constant 0 : index
      %c0_16 = arith.constant 0 : index
      %21 = vector.load %arg8[%c0_15, %c0_16] : memref<2x8xf32, #tpu.memory_space<vmem>>, vector<2x8xf32>
      %c0_17 = arith.constant 0 : index
      %c0_18 = arith.constant 0 : index
      %22 = vector.load %arg5[%c0_17, %c0_18] : memref<1x8xf32, #tpu.memory_space<vmem>>, vector<1x8xf32>
      %23 = vector.broadcast %22 : vector<1x8xf32> to vector<2x8xf32>
      %24 = arith.addf %21, %23 : vector<2x8xf32>
      %c0_19 = arith.constant 0 : index
      %c0_20 = arith.constant 0 : index
      %25 = vector.load %arg6[%c0_19, %c0_20] : memref<2x8xf32, #tpu.memory_space<vmem>>, vector<2x8xf32>
      tpu.vector_store %arg6[%c0_19, %c0_20], %24 {strides = array<i32>} : memref<2x8xf32, #tpu.memory_space<vmem>>, vector<2x8xf32>,
    } else {
    }
    return
  }
  func.func @transform_0(%arg0: i32, %arg1: i32, %arg2: i32) -> (i32, i32, i32) {
    %c0_i32 = arith.constant 0 : i32
    return %arg0, %arg1, %arg2 : i32, i32, i32
  }
  func.func @transform_1(%arg0: i32, %arg1: i32, %arg2: i32) -> (i32, i32) {
    %c0_i32 = arith.constant 0 : i32
    %c0_i32_0 = arith.constant 0 : i32
    return %arg1, %c0_i32 : i32, i32
  }
  func.func @transform_2(%arg0: i32, %arg1: i32, %arg2: i32) -> (i32, i32) {
    %c0_i32 = arith.constant 0 : i32
    %c0_i32_0 = arith.constant 0 : i32
    %c0_i32_1 = arith.constant 0 : i32
    return %c0_i32, %c0_i32_0 : i32, i32
  }
  func.func @transform_3(%arg0: i32, %arg1: i32, %arg2: i32) -> (i32, i32) {
    %c0_i32 = arith.constant 0 : i32
    %c0_i32_0 = arith.constant 0 : i32
    return %arg0, %c0_i32 : i32, i32
  }
}

</mosaic_0001>

<bundles_post_ra>
// kernel: tpu_custom_call.1
= control target key start
LH: loop header
LB: loop body
LE: loop exit
PB: predicated region body
PF: predicated region fallthrough
CT: control target
= control target key end

     0   :  { %8 = vsyncpa [#allocation5], 0  ;;  %s375_s0 = inlined_call_operand.hbm [shape: f32[2,4,256], index: 0, kind: input, shape index: {}]   ;;  %s376_s1 = inlined_call_operand.hbm [shape: f32[4,8], index: 1, kind: input, shape index: {}]   ;;  %s377_s2 = inlined_call_operand.vmem [shape: f32[1,8], index: 2, kind: input, shape index: {}]   ;;  %s378_s3 = inlined_call_operand.hbm [shape: f32[2,8], index: 3, kind: output, shape index: {}]  }
   0x1   :  { %9 = vsyncpa [#allocation8], 0 }
   0x2   :  { %10 = vsyncpa [#allocation6], 0  ;;  %s299_s12 = smov [#allocation4]   ;;  %s227_s16 = scalar_lea.hbm %s375_s0, 256 }
   0x3   :  { %s16_s13 = sshll.u32 %s299_s12, 4  ;;  %p228_p0 = scmp.ne.s32.totalorder %s375_s0, %s227_s16  ;;  %s17_s13 = int_to_ptr.vmem [resolvable:$true] %s16_s13 }
   0x4   :  { %p231_p1 = scmp.lt.u32.totalorder %s227_s16, %s375_s0 }
   0x6   :  { %p233_p2 = pnand %p231_p1, %p228_p0 }
   0x8   :  { %236 = shalt.err (!%p233_p2)
}
   0x9   :  { %s237_s21 = scalar_lea.vmem %s17_s13, 256  ;;  %p242_p4 = scmp.lt.s32.totalorder %s17_s13, %s17_s13 }
   0xa   :  { %p238_p3 = scmp.ne.s32.totalorder %s17_s13, %s237_s21  ;;  %p243_p5 = scmp.lt.s32.totalorder %s237_s21, %s237_s21 }
   0xc   :  { %p244_p6 = por %p243_p5, %p242_p4 }
   0xe   :  { %p245_p7 = pnand %p244_p6, %p238_p3 }
  0x10   :  { %248 = shalt.err (!%p245_p7)
}
  0x11   :  { %s300_s22 = smov 128   ;;  %s301_s23 = smov 8  }
  0x12   :  { %22 = dma.hbm_to_vmem [thread:$0]  %s375_s0, 256, %s17_s13, [#allocation5], %s300_s22, %s300_s22, %s301_s23  }
  0x13   :  { %s302_s26 = smov [#allocation7]   ;;  %s249_s30 = scalar_lea.hbm %s376_s1, 64 }
  0x14   :  { %s29_s27 = sshll.u32 %s302_s26, 4  ;;  %p250_p8 = scmp.ne.s32.totalorder %s376_s1, %s249_s30  ;;  %s30_s27 = int_to_ptr.vmem [resolvable:$true] %s29_s27 }
  0x15   :  { %p253_p9 = scmp.lt.u32.totalorder %s249_s30, %s376_s1 }
  0x17   :  { %p255_p10 = pnand %p253_p9, %p250_p8 }
  0x19   :  { %258 = shalt.err (!%p255_p10)
}
  0x1a   :  { %s259_s8 = scalar_lea.vmem %s30_s27, 64  ;;  %p264_p12 = scmp.lt.s32.totalorder %s30_s27, %s30_s27 }
  0x1b   :  { %p260_p11 = scmp.ne.s32.totalorder %s30_s27, %s259_s8  ;;  %p265_p13 = scmp.lt.s32.totalorder %s259_s8, %s259_s8 }
  0x1d   :  { %p266_p0 = por %p265_p13, %p264_p12 }
  0x1f   :  { %p267_p1 = pnand %p266_p0, %p260_p11 }
  0x21   :  { %270 = shalt.err (!%p267_p1)
}
  0x22   :  { %32 = dma.hbm_to_vmem [thread:$0]  %s376_s1, 64, %s30_s27, [#allocation8]  }
  0x23   :  { %293 = dma.done.wait [#allocation5], 256  }
  0x24   :  { %294 = vsyncadd [#allocation5], 4294967040 }
  0x25   :  { %295 = dma.done.wait [#allocation8], 64  }
  0x26   :  { %296 = vsyncadd [#allocation8], 4294967232  ;;  %vm63_vm0 = vcmask 1043456   ;;  %v55_v0 = vld [vmem:[#allocation4] sm:$0xff]  ;;  %v56_v1 = vld [vmem:[#allocation4 + $0x8] sm:$0xff]  ;;  %vm52_vm1 = vcmask 25600   ;;  %v76_v12 = vlaneseq }
  0x27   :  { %v59_v2 = vcombine.high %v55_v0, %v55_v0  ;;  %v64_v3 = vsel %vm63_vm0, %v55_v0, 0.0  ;;  %v60_v4 = vcombine.high %v56_v1, %v56_v1  ;;  %v69_v6 = vsel %vm63_vm0, %v56_v1, 0.0  ;;  %v98_v11 = vld [vmem:[#allocation7] sm:$0xf]  ;;  %v210_v29 = vld [vmem:[%s377_s2] ss:$0 sm:$0xff] }
  0x28   :  { %v303_v10 = vmov 0.0   ;;  %vm304_vm2 = vmmov 0   ;;  %vm47_vm3 = vcmask 58368   ;;  %v77_v13 = vand.u32 127, %v76_v12  ;;  %s305_s11 = smov [#allocation9]  }
  0x29   :  { %v65_v5 = vsel %vm63_vm0, %v59_v2, 0.0  ;;  %v70_v7 = vsel %vm63_vm0, %v60_v4, 0.0  ;;  %53 = vst.msk [vmem:[#allocation2] sm:$0x3] %vm52_vm1, %v303_v10  ;;  %213 = vmatprep.subr.mxu0 %v303_v10  ;;  %215 = vmatprep.mubr.msk.f32.mxu0 %vm304_vm2, %v303_v10  ;;  %v79_v14 = vshrl.u32 %v76_v12, 7  ;;  %vm86_vm4 = vcmask 1041409  }
  0x2a   :  { %v66_v8 = vadd.f32 %v65_v5, %v64_v3  ;;  %v71_v9 = vadd.f32 %v70_v7, %v69_v6  ;;  %214 = vmatpush3.msk.msra.mxu0 %vm63_vm0, %v98_v11  ;;  %48 = vst.msk [vmem:[#allocation3] sm:$0x3] %vm47_vm3, %v303_v10  ;;  %vm99_vm5 = vcmask 31744   ;;  %s198_s12 = sshll.u32 %s305_s11, 4  ;;  %s199_s12 = int_to_ptr.vmem [resolvable:$true] %s198_s12 }
  0x2b   :  { %v80_v16 = vsub.s32 %v77_v13, %v79_v14  ;;  %s271_s13 = scalar_lea.vmem %s199_s12, 32  ;;  %p276_p3 = scmp.lt.s32.totalorder %s199_s12, %s199_s12 }
  0x2c   :  { %67 = vadd.xlane.f32.xlu0 %v66_v8  ;;  %p272_p2 = scmp.ne.s32.totalorder %s199_s12, %s271_s13  ;;  %p277_p4 = scmp.lt.s32.totalorder %s271_s13, %s271_s13 }
  0x2e   :  { %p278_p5 = por %p277_p4, %p276_p3 }
  0x30   :  { %72 = vadd.xlane.f32.xlu0 %v71_v9  ;;  %v54_v20 = vld [vmem:[#allocation2] sm:$0x3]  ;;  %p279_p6 = pnand %p278_p5, %p272_p2 }
  0x31   :  { %v97_v25 = vld [vmem:[#allocation3] sm:$0x3] }
  0xb9   :  { %v68_v15 = vpop.xlane.xlu0 %67 }
  0xba   :  { %v81_v18 = vrot.slane %v68_v15, %v80_v16 }
  0xbd   :  { %v73_v17 = vpop.xlane.xlu0 %72 }
  0xbe   :  { %v85_v19 = vrot.slane %v73_v17, %v80_v16 }
  0xc0   :  { %v87_v21 = vsel %vm86_vm4, %v85_v19, %v81_v18 }
  0xc1   :  { %v89_v22 = vadd.f32 %v87_v21, %v54_v20 }
  0xc3   :  { %91 = vst.msk [vmem:[#allocation2] sm:$0x3] %vm52_vm1, %v89_v22 }
  0xca   :  { %v95_v23 = vld [vmem:[#allocation2] sm:$0x3] }
  0xcb   :  { %v96_v24 = vmul.f32 0.00390625, %v95_v23 }
  0xcd   :  { %216 = vmatmul.mubr.msk.f32.vlgmr.msra.gmra.mrb[0].mxu0 %vm99_vm5, %v96_v24 }
 0x1a0   :  { %v172_v26 = vpop.f32.mrb[0].mxu0 }
 0x1a1   :  { %v176_v27 = vadd.f32 %v172_v26, %v97_v25  ;;  %v217_v28 = vpop.f32.mrb[1].mxu0 }
 0x1a3   :  { %178 = vst.msk [vmem:[#allocation3] sm:$0x3] %vm47_vm3, %v176_v27 }
 0x1aa   :  { %v181_v30 = vld [vmem:[#allocation3] sm:$0x3] }
 0x1ab   :  { %v189_v31 = vadd.f32 %v210_v29, %v181_v30 }
 0x1ad   :  { %191 = vst.msk [vmem:[#allocation9] sm:$0x3] %vm47_vm3, %v189_v31 }
 0x1ae   :  { %282 = shalt.err (!%p279_p6)
}
 0x1af   :  { %s283_s16 = scalar_lea.hbm %s378_s3, 32 }
 0x1b0   :  { %p284_p7 = scmp.ne.s32.totalorder %s378_s3, %s283_s16  ;;  %p287_p8 = scmp.lt.u32.totalorder %s283_s16, %s378_s3 }
 0x1b2   :  { %p289_p9 = pnand %p287_p8, %p284_p7 }
 0x1b4   :  { %292 = shalt.err (!%p289_p9)
}
 0x1b5   :  { %201 = dma.vmem_to_hbm [thread:$0]  %s199_s12, 32, %s378_s3, [#allocation6]  }
 0x1b6   :  { %297 = dma.done.wait [#allocation6], 32  }
 0x1b7   :  { %298 = vsyncadd [#allocation6], 4294967264 }
 0x1b8   :  { %205 = vsyncpa [#allocation5], 1 }
 0x1b9   :  { %206 = vsyncpa [#allocation8], 1 }
 0x1ba   :  { %207 = vsyncpa [#allocation6], 1 }

</bundles_post_ra>
